<compile_context>
chip_gen: v5e
topology: v5e:2x2
jax: 0.10.0
libtpu: 0.0.40
codegen_flags: <defaults>
</compile_context>

<pallas_src>
import jax
import jax.numpy as jnp
from jax.experimental import pallas as pl
from jax.experimental.pallas import tpu as pltpu


_TM_CAP = 1024           # sublane-axis tile cap for the (batch*seq) axis
_TN_CAP = 1024           # lane-axis tile cap for the vocab axis
_TK_CAP = 512            # lane-axis tile cap for the hidden (contraction) axis
_SMALL_FULL_DIM = 2048   # below this, a non-128-multiple dim becomes a full-dim block
_COMPUTE_DTYPE = jnp.bfloat16  # matmul streaming/compute dtype (accumulation stays f32)


def _cdiv(a, b):
    return -(-a // b)


def _round_up(x, m):
    return _cdiv(x, m) * m


def _vmem_capacity_bytes():
    try:
        return int(pltpu.get_tpu_info().vmem_capacity_bytes)
    except Exception:
        return 64 << 20  # conservative (v7x per-core) default


def _largest_divisor_tile(dim, cap, unit=128):
    """Largest multiple of `unit` that divides `dim`, capped at `cap` (dim % unit == 0)."""
    best, t = unit, unit
    while t <= min(cap, dim):
        if dim % t == 0:
            best = t
        t += unit
    return best


def _pick_lane_tile(dim, cap):
    """(tile, padded_dim) for a lane-axis dimension, preferring zero padding."""
    if dim % 128 == 0:
        t = _largest_divisor_tile(dim, cap)
        if dim <= cap or t >= min(cap, 512):
            return t, dim                       # no padding, lane-dense tile
        t = min(cap, 512)                       # awkward factorization -> pad
        return t, _round_up(dim, t)
    if dim <= _SMALL_FULL_DIM:
        return dim, dim                         # full-dim block: no padding needed
    # TODO(synk): for large, non-128-multiple vocab/hidden, pad+cast W once at init
    # (or use a cdiv grid with masked edge stores) instead of this per-call pad.
    t = min(cap, 512)
    return t, _round_up(dim, t)


def _choose_tiles(M, K, N):
    # tm (sublane axis): split M into near-equal multiple-of-8 chunks (<= _TM_CAP);
    # small/decode M collapses to a single i-block so W streams from HBM once.
    if M <= _TM_CAP:
        tm, num_i = _round_up(M, 8), 1
    else:
        num_i = _cdiv(M, _TM_CAP)
        tm = _round_up(_cdiv(M, num_i), 8)
    Mp = tm * num_i
    tk, Kp = _pick_lane_tile(K, _TK_CAP)
    tn, Np = _pick_lane_tile(N, _TN_CAP)
    return tm, tn, tk, Mp, Kp, Np


def _matmul_kernel_f32out(x_ref, w_ref, o_ref):
    """o[i,j] = sum_k x[i,k] @ w[j,k]^T, accumulating in the resident f32 output."""
    part = jax.lax.dot_general(
        x_ref[...],
        w_ref[...],
        dimension_numbers=(((1,), (1,)), ((), ())),  # contract on last dim of both
        preferred_element_type=jnp.float32,
    )

    @pl.when(pl.program_id(2) == 0)
    def _():
        o_ref[...] = part                    # first k-step: plain store (no zero+RMW)

    @pl.when(pl.program_id(2) != 0)
    def _():
        o_ref[...] += part


def _matmul_kernel_acc(x_ref, w_ref, o_ref, acc_ref):
    """Same matmul with an f32 VMEM accumulator for non-f32 output dtypes."""
    part = jax.lax.dot_general(
        x_ref[...],
        w_ref[...],
        dimension_numbers=(((1,), (1,)), ((), ())),
        preferred_element_type=jnp.float32,
    )

    @pl.when(pl.program_id(2) == 0)
    def _():
        acc_ref[...] = part

    @pl.when(pl.program_id(2) != 0)
    def _():
        acc_ref[...] += part

    @pl.when(pl.program_id(2) == pl.num_programs(2) - 1)
    def _():
        o_ref[...] = acc_ref[...].astype(o_ref.dtype)


def _lm_head_matmul(x2d, w, *, tm, tn, tk, out_dtype):
    """x2d: (Mp, Kp) compute-dtype, w: (Np, Kp) compute-dtype (PyTorch nn.Linear layout)."""
    Mp, Kp = x2d.shape
    Np, Kp2 = w.shape
    assert Kp == Kp2
    assert Mp % tm == 0 and Np % tn == 0 and Kp % tk == 0

    grid = (Np // tn, Mp // tm, Kp // tk)   # vocab outermost (megacore split), K innermost

    f32_out = jnp.dtype(out_dtype) == jnp.dtype(jnp.float32)
    kernel = _matmul_kernel_f32out if f32_out else _matmul_kernel_acc
    scratch = [] if f32_out else [pltpu.VMEM((tm, tn), jnp.float32)]

    x_b = jnp.dtype(x2d.dtype).itemsize
    w_b = jnp.dtype(w.dtype).itemsize
    o_b = jnp.dtype(out_dtype).itemsize

    # Advisory cost estimate that accounts for the re-streaming implied by the tiling.
    bytes_accessed = int(grid[0] * Mp * Kp * x_b + grid[1] * Np * Kp * w_b + Mp * Np * o_b)
    cost = pl.CostEstimate(flops=2 * Mp * Np * Kp, transcendentals=0,
                           bytes_accessed=bytes_accessed)

    # Real working set: double-buffered x/W tiles, double-buffered output block,
    # optional f32 accumulator. ~50% headroom, capped generation-aware.
    work = (2 * tm * tk * x_b + 2 * tn * tk * w_b + 2 * tm * tn * o_b
            + (0 if f32_out else tm * tn * 4))
    vmem_cap = int(0.75 * _vmem_capacity_bytes())        # ~48 MiB v7x, ~96 MiB v5e/v6e
    vmem_limit = max(min(int(work * 1.5) + (2 << 20), vmem_cap), 4 << 20)

    # TODO(synk): decode micro-opt: k-independent x BlockSpec + in-kernel pl.ds slicing,
    # and an fp8-weight path on v7x, are further levers not applied here.
    return pl.pallas_call(
        kernel,
        out_shape=jax.ShapeDtypeStruct((Mp, Np), out_dtype),
        grid_spec=pltpu.PrefetchScalarGridSpec(
            num_scalar_prefetch=0,
            grid=grid,
            in_specs=[
                pl.BlockSpec((tm, tk), lambda j, i, k: (i, k)),  # x tile
                pl.BlockSpec((tn, tk), lambda j, i, k: (j, k)),  # W tile, native (vocab, hidden)
            ],
            out_specs=pl.BlockSpec((tm, tn), lambda j, i, k: (i, j)),
            scratch_shapes=scratch,
        ),
        compiler_params=pltpu.CompilerParams(
            dimension_semantics=("parallel", "parallel", "arbitrary"),
            vmem_limit_bytes=vmem_limit,
        ),
        cost_estimate=cost,
    )(x2d, w)


@jax.jit
def predict_layer(x, weight):
    """score = x @ weight.T  (nn.Linear(hidden, vocab_num, bias=False))

    x:      (batch, seq, hidden)
    weight: (vocab_num, hidden)  -- PyTorch nn.Linear layout, NOT transposed here
    returns (batch, seq, vocab_num) in x.dtype (bf16 matmul, f32 accumulation)
    """
    B, S, H = x.shape
    V, H2 = weight.shape
    assert H == H2

    M, K, N = B * S, H, V
    tm, tn, tk, Mp, Kp, Np = _choose_tiles(M, K, N)

    out_dtype = x.dtype

    # bf16 compute path (keep f32 accumulation). In production the weight should be
    # stored pre-cast in bf16 so this per-call cast is free.
    xc = x.reshape(M, K)
    if xc.dtype != _COMPUTE_DTYPE:
        xc = xc.astype(_COMPUTE_DTYPE)
    wc = weight if weight.dtype == _COMPUTE_DTYPE else weight.astype(_COMPUTE_DTYPE)

    if (Mp, Kp) != (M, K):
        xc = jnp.pad(xc, ((0, Mp - M), (0, Kp - K)))   # zero-pad: exact for the matmul
    if (Np, Kp) != (N, K):
        wc = jnp.pad(wc, ((0, Np - N), (0, Kp - K)))

    out = _lm_head_matmul(xc, wc, tm=tm, tn=tn, tk=tk, out_dtype=out_dtype)
    return out[:M, :N].reshape(B, S, N)


if __name__ == "__main__":
    # hyp = {'hidden': 32, 'vocab_num': 64}
    batch, seq, hidden, vocab_num = 2, 8, 32, 64

    key = jax.random.PRNGKey(0)
    kx, kw = jax.random.split(key)

    x = jax.random.normal(kx, (batch, seq, hidden), dtype=jnp.float32)
    # Deterministic init mimicking nn.Linear's uniform(-1/sqrt(hidden), 1/sqrt(hidden))
    bound = 1.0 / jnp.sqrt(jnp.float32(hidden))
    weight = jax.random.uniform(
        kw, (vocab_num, hidden), dtype=jnp.float32, minval=-bound, maxval=bound
    )

    score = predict_layer(x, weight)
    jax.block_until_ready(score)
    assert score.shape == (batch, seq, vocab_num)

    # Reference with the same bf16-inputs / f32-accumulation numerics as the kernel.
    ref = jnp.einsum(
        "bsh,vh->bsv",
        x.astype(_COMPUTE_DTYPE),
        weight.astype(_COMPUTE_DTYPE),
        preferred_element_type=jnp.float32,
    ).astype(x.dtype)
    assert jnp.allclose(score, ref, atol=1e-3, rtol=1e-3)

    # Loose sanity check against the pure-f32 reference (bf16 rounding only).
    ref_f32 = jnp.einsum("bsh,vh->bsv", x, weight)
    assert jnp.allclose(score, ref_f32, atol=5e-2, rtol=5e-2)

    print("KERNEL_OK")
</pallas_src>

<mosaic_0001>
module attributes {stable_mosaic.version = 11 : i64} {
  func.func @_matmul_kernel_f32out(%arg0: i32, %arg1: i32, %arg2: i32, %arg3: memref<16x32xbf16, #tpu.memory_space<vmem>>, %arg4: memref<64x32xbf16, #tpu.memory_space<vmem>>, %arg5: memref<16x64xf32, #tpu.memory_space<vmem>>) attributes {dimension_semantics = [#tpu.dimension_semantics<parallel>, #tpu.dimension_semantics<parallel>, #tpu.dimension_semantics<arbitrary>], iteration_bounds = array<i64: 1, 1, 1>, scalar_prefetch = 0 : i64, scratch_operands = 0 : i64, tpu.core_type = #tpu.core_type<tc>, window_params = [{transform_indices = @transform_0, window_bounds = array<i64: 16, 32>}, {transform_indices = @transform_1, window_bounds = array<i64: 64, 32>}, {transform_indices = @transform_2, window_bounds = array<i64: 16, 64>}]} {
    %c0 = arith.constant 0 : index
    %c0_0 = arith.constant 0 : index
    %0 = vector.load %arg3[%c0, %c0_0] : memref<16x32xbf16, #tpu.memory_space<vmem>>, vector<16x32xbf16>
    %c0_1 = arith.constant 0 : index
    %c0_2 = arith.constant 0 : index
    %1 = vector.load %arg4[%c0_1, %c0_2] : memref<64x32xbf16, #tpu.memory_space<vmem>>, vector<64x32xbf16>
    %cst = arith.constant dense<0.000000e+00> : vector<16x64xf32>
    %2 = tpu.matmul %0, %1, %cst {dimension_numbers = #tpu.dot_dimension_numbers<[1], [1], [0], [0], [0, 0, 1, 0], [], []>} : vector<16x32xbf16>, vector<64x32xbf16>, vector<16x64xf32> -> vector<16x64xf32>
    %c0_i32 = arith.constant 0 : i32
    %3 = arith.cmpi eq, %arg2, %c0_i32 : i32
    %4 = arith.extui %3 : i1 to i32
    %c0_i32_3 = arith.constant 0 : i32
    %5 = arith.cmpi ne, %4, %c0_i32_3 : i32
    scf.if %5 {
      %c0_6 = arith.constant 0 : index
      %c0_7 = arith.constant 0 : index
      %9 = vector.load %arg5[%c0_6, %c0_7] : memref<16x64xf32, #tpu.memory_space<vmem>>, vector<16x64xf32>
      tpu.vector_store %arg5[%c0_6, %c0_7], %2 {strides = array<i32>} : memref<16x64xf32, #tpu.memory_space<vmem>>, vector<16x64xf32>,
    } else {
    }
    %c0_i32_4 = arith.constant 0 : i32
    %6 = arith.cmpi ne, %arg2, %c0_i32_4 : i32
    %7 = arith.extui %6 : i1 to i32
    %c0_i32_5 = arith.constant 0 : i32
    %8 = arith.cmpi ne, %7, %c0_i32_5 : i32
    scf.if %8 {
      %c0_6 = arith.constant 0 : index
      %c0_7 = arith.constant 0 : index
      %9 = vector.load %arg5[%c0_6, %c0_7] : memref<16x64xf32, #tpu.memory_space<vmem>>, vector<16x64xf32>
      %10 = arith.addf %9, %2 : vector<16x64xf32>
      %c0_8 = arith.constant 0 : index
      %c0_9 = arith.constant 0 : index
      %11 = vector.load %arg5[%c0_8, %c0_9] : memref<16x64xf32, #tpu.memory_space<vmem>>, vector<16x64xf32>
      tpu.vector_store %arg5[%c0_8, %c0_9], %10 {strides = array<i32>} : memref<16x64xf32, #tpu.memory_space<vmem>>, vector<16x64xf32>,
    } else {
    }
    return
  }
  func.func @transform_0(%arg0: i32, %arg1: i32, %arg2: i32) -> (i32, i32) {
    %c0_i32 = arith.constant 0 : i32
    return %arg1, %arg2 : i32, i32
  }
  func.func @transform_1(%arg0: i32, %arg1: i32, %arg2: i32) -> (i32, i32) {
    %c0_i32 = arith.constant 0 : i32
    return %arg0, %arg2 : i32, i32
  }
  func.func @transform_2(%arg0: i32, %arg1: i32, %arg2: i32) -> (i32, i32) {
    %c0_i32 = arith.constant 0 : i32
    return %arg1, %arg0 : i32, i32
  }
}

</mosaic_0001>

<bundles_post_ra>
// kernel: predict_layer.1
= control target key start
LH: loop header
LB: loop body
LE: loop exit
PB: predicated region body
PF: predicated region fallthrough
CT: control target
= control target key end

     0   :  { %vm48_vm0 = vcmask 261120   ;;  %s205_s0 = inlined_call_operand.vmem [shape: bf16[16,32], index: 0, kind: input, shape index: {}]   ;;  %s206_s1 = inlined_call_operand.vmem [shape: bf16[64,32], index: 1, kind: input, shape index: {}]   ;;  %s207_s2 = inlined_call_operand.hbm [shape: f32[16,64], index: 2, kind: output, shape index: {}]  }
   0x1   :  { %v139_v0 = vld [vmem:[%s206_s1 + $0x18] sm:$0xff] }
   0x2   :  { %7 = vsyncpa [#allocation3], 0  ;;  %v62_v1 = vsel %vm48_vm0, %v139_v0, 0  ;;  %v138_v2 = vld [vmem:[%s206_s1 + $0x10] sm:$0xff]  ;;  %v137_v4 = vld [vmem:[%s206_s1 + $0x8] sm:$0xff]  ;;  %vm82_vm1 = vcmask 523264  }
   0x3   :  { %68 = vmatpush.bf16.xpose.msra.mxu0 %v62_v1  ;;  %v59_v3 = vsel %vm48_vm0, %v138_v2, 0  ;;  %v56_v5 = vsel %vm48_vm0, %v137_v4, 0  ;;  %v136_v6 = vld [vmem:[%s206_s1] sm:$0xff]  ;;  %s169_s19 = smov [#allocation2]   ;;  %s102_s23 = sshll.u32 %s207_s2, 4  ;;  %s103_s23 = int_to_ptr.hbm [resolvable:$true] %s102_s23 }
   0x4   :  { %v53_v7 = vsel %vm48_vm0, %v136_v6, 0  ;;  %v135_v8 = vld [vmem:[%s205_s0] sm:$0xff]  ;;  %s100_s20 = sshll.u32 %s169_s19, 4  ;;  %s170_s1 = smov 128   ;;  %s101_s20 = int_to_ptr.vmem [resolvable:$true] %s100_s20 }
   0x5   :  { %s171_s24 = smov 8  }
   0xb   :  { %69 = vmatpush.bf16.xpose.msra.mxu0 %v59_v3 }
  0x13   :  { %70 = vmatpush.bf16.xpose.msra.mxu0 %v56_v5 }
  0x1b   :  { %71 = vmatpush.bf16.xpose.msra.mxu0 %v53_v7 }
  0x22   :  { %134 = vmatmul.msk.bf16.vlgmr.msra.gmra.mxu0 %vm48_vm0, %v135_v8 }
  0x9f   :  { %v73_v9 = vpop.f32.mrf.mxu0 }
  0xa0   :  { %83 = vst.msk [vmem:[#allocation2] sm:$0xff] %vm82_vm1, %v73_v9 }
  0xa7   :  { %v75_v10 = vpop.f32.mrf.mxu0 }
  0xa8   :  { %84 = vst.msk [vmem:[#allocation2 + $0x8] sm:$0xff] %vm82_vm1, %v75_v10 }
  0xa9   :  { %108 = dma.vmem_to_hbm [thread:$0]  %s101_s20, 256, %s103_s23, [#allocation3], %s170_s1, %s170_s1, %s171_s24  }
  0xaa   :  { %167 = dma.done.wait [#allocation3], 256  }
  0xab   :  { %168 = vsyncadd [#allocation3], 4294967040 }
  0xac   :  { %113 = vsyncpa [#allocation3], 1 }

</bundles_post_ra>
